<compile_context>
chip_gen: v7x
topology: tpu7x:2x2x1
jax: 0.10.0
libtpu: 0.0.40
codegen_flags: <defaults>
</compile_context>

<pallas_src>
import functools

import jax
import jax.numpy as jnp
from jax import lax
from jax.experimental import pallas as pl
from jax.experimental.pallas import tpu as pltpu

LANE = 128   # lane width: last-dim alignment for lane-dense stores / MXU


def _round_up(x, m):
    return (x + m - 1) // m * m


def _pad_rows(x, rows):
    if x.shape[0] == rows:
        return x
    return jnp.zeros((rows,) + x.shape[1:], x.dtype).at[: x.shape[0]].set(x)


# ---------------------------------------------------------------------------
# Shared tower math (runs inside the kernels).
#   Linear -> [ReLU -> Linear(shared hidden)] * layers -> ReLU -> Linear
# bf16 MXU operands, f32 accumulation; ReLU/bias adds stay f32.
# ---------------------------------------------------------------------------
def _tower(x, w1, b1, wh, bh, wo, bo, layers: int):
    rows = x.shape[0]
    # Hoist bias broadcasts out of the loop (JAX does not CSE broadcast_in_dim).
    b1_b = jnp.broadcast_to(b1, (rows, b1.shape[-1]))
    bh_b = jnp.broadcast_to(bh, (rows, bh.shape[-1]))
    bo_b = jnp.broadcast_to(bo, (rows, bo.shape[-1]))
    h = jnp.dot(x.astype(jnp.bfloat16), w1,
                preferred_element_type=jnp.float32) + b1_b
    # The PyTorch module reuses the SAME hidden Linear instance `layers` times.
    for _ in range(layers):
        h = jnp.maximum(h, 0.0)
        h = jnp.dot(h.astype(jnp.bfloat16), wh,
                    preferred_element_type=jnp.float32) + bh_b
    h = jnp.maximum(h, 0.0)
    return jnp.dot(h.astype(jnp.bfloat16), wo,
                   preferred_element_type=jnp.float32) + bo_b


# ---------------------------------------------------------------------------
# Kernel 1: nudge tower (computed once, whole arrays in VMEM).
# ---------------------------------------------------------------------------
def nudge_tower_kernel(x_ref, w1_ref, b1_ref, wh_ref, bh_ref, wo_ref, bo_ref,
                       emb_ref, *, layers: int):
    emb = _tower(x_ref[...], w1_ref[...], b1_ref[...], wh_ref[...],
                 bh_ref[...], wo_ref[...], bo_ref[...], layers)
    # Store bf16: halves the resident DMA into the gridded score kernel and it
    # would be cast to bf16 for the score matmul anyway.
    emb_ref[...] = emb.astype(emb_ref.dtype)


# ---------------------------------------------------------------------------
# Kernel 2: user tower + scores, gridded over user-batch tiles.
# Weights and the nudge embedding matrix are VMEM-resident across the grid.
# ---------------------------------------------------------------------------
def user_score_kernel(x_ref, w1_ref, b1_ref, wh_ref, bh_ref, wo_ref, bo_ref,
                      n_emb_ref, out_ref, *, layers: int):
    u_emb = _tower(x_ref[...], w1_ref[...], b1_ref[...], wh_ref[...],
                   bh_ref[...], wo_ref[...], bo_ref[...], layers)
    # scores = u_emb @ n_emb.T expressed as an NT contraction over the last
    # dim of both operands (no explicit transpose on the critical path).
    # TODO(synk): confirm via pl.lower_as_mlir that no hidden relayout of
    # n_emb is emitted; if it is, have the nudge tower emit (E, Bn) directly.
    out_ref[...] = lax.dot_general(
        u_emb.astype(jnp.bfloat16), n_emb_ref[...],
        dimension_numbers=(((1,), (1,)), ((), ())),
        preferred_element_type=jnp.float32)


# ---------------------------------------------------------------------------
# Wrapper
# ---------------------------------------------------------------------------
def two_tower_forward(user_input, nudge_input, user_params, nudge_params,
                      u_layers: int, n_layers: int, *, tile_b: int = 128):
    # TODO(synk): bump tile_b to 256 on v6e/v7x (2x256^2 MXU) for large batches,
    # and consider pipeline_mode=pl.Buffered(3) on the user-input BlockSpec if
    # its DMA ends up exposed behind the short per-tile compute.
    Bu, Du = user_input.shape
    Bn, _ = nudge_input.shape
    Hu = user_params[0].shape[1]
    E = user_params[4].shape[1]

    Bu_p = _round_up(Bu, tile_b)        # whole tiles over the user batch
    Bn_p = _round_up(Bn, LANE)          # lane-dense output tile (last dim % 128)

    u_x = _pad_rows(user_input, Bu_p)
    n_x = _pad_rows(nudge_input, Bn_p)

    # --- Pass 1: nudge tower, computed ONCE (not per user tile). ------------
    n_emb = pl.pallas_call(
        functools.partial(nudge_tower_kernel, layers=n_layers),
        out_shape=jax.ShapeDtypeStruct((Bn_p, E), jnp.bfloat16),
        in_specs=[pl.BlockSpec(memory_space=pltpu.MemorySpace.VMEM)] * 7,
        out_specs=pl.BlockSpec(memory_space=pltpu.MemorySpace.VMEM),
    )(n_x, *nudge_params)

    # --- Pass 2: user tower + scores, gridded over user-batch tiles. --------
    grid = (Bu_p // tile_b,)
    res = lambda i: (0, 0)              # resident: weights / nudge embeddings
    in_specs = [
        pl.BlockSpec((tile_b, Du), lambda i: (i, 0)),   # pipelined input tile
        pl.BlockSpec((Du, Hu), res), pl.BlockSpec((1, Hu), res),
        pl.BlockSpec((Hu, Hu), res), pl.BlockSpec((1, Hu), res),
        pl.BlockSpec((Hu, E), res),  pl.BlockSpec((1, E), res),
        pl.BlockSpec((Bn_p, E), res),
    ]
    out_spec = pl.BlockSpec((tile_b, Bn_p), lambda i: (i, 0))

    # VMEM budget (matters on v7x: 64 MiB physical / 32 MiB default scoped).
    est = (2 * tile_b * Du * 4                        # double-buffered input
           + 2 * 2 * (Du * Hu + Hu * Hu + Hu * E)     # bf16 weights
           + 2 * 4 * (Hu + Hu + E)                    # f32 biases
           + 2 * 2 * Bn_p * E                         # bf16 nudge embeddings
           + 2 * tile_b * Bn_p * 4                    # double-buffered output
           + 4 * tile_b * Hu * 4)                     # activation headroom
    vmem_limit = int(min(64 << 20, max(16 << 20, 4 * est)))

    scores = pl.pallas_call(
        functools.partial(user_score_kernel, layers=u_layers),
        out_shape=jax.ShapeDtypeStruct((Bu_p, Bn_p), jnp.float32),
        grid=grid,
        in_specs=in_specs,
        out_specs=out_spec,
        compiler_params=pltpu.CompilerParams(
            dimension_semantics=("parallel",),        # dual-TC sharding on v7x
            vmem_limit_bytes=vmem_limit),
    )(u_x, *user_params, n_emb)

    return scores[:Bu, :Bn]


# ---------------------------------------------------------------------------
# Deterministic parameter init (PyTorch-Linear-style uniform fan-in bounds).
# Weights stored bf16 at rest (halved DMA); biases kept f32.
# ---------------------------------------------------------------------------
def init_linear(key, in_dim, out_dim):
    kw, kb = jax.random.split(key)
    bound = 1.0 / (in_dim ** 0.5)
    w = jax.random.uniform(kw, (in_dim, out_dim), jnp.float32, -bound, bound)
    b = jax.random.uniform(kb, (1, out_dim), jnp.float32, -bound, bound)
    return w.astype(jnp.bfloat16), b


def init_tower(key, input_dim, hidden_dim, embedding_dim):
    k1, k2, k3 = jax.random.split(key, 3)
    w1, b1 = init_linear(k1, input_dim, hidden_dim)
    wh, bh = init_linear(k2, hidden_dim, hidden_dim)
    wo, bo = init_linear(k3, hidden_dim, embedding_dim)
    return (w1, b1, wh, bh, wo, bo)


# ---------------------------------------------------------------------------
# Pure-JAX f32 reference (same bf16-at-rest weights, upcast to f32).
# ---------------------------------------------------------------------------
def tower_ref(x, params, layers):
    w1, b1, wh, bh, wo, bo = params
    w1, wh, wo = (w.astype(jnp.float32) for w in (w1, wh, wo))
    h = x @ w1 + b1
    for _ in range(layers):
        h = jnp.maximum(h, 0.0)
        h = h @ wh + bh
    h = jnp.maximum(h, 0.0)
    return h @ wo + bo


def two_tower_ref(user_input, nudge_input, up, np_, u_layers, n_layers):
    return tower_ref(user_input, up, u_layers) @ tower_ref(
        nudge_input, np_, n_layers).T


# ---------------------------------------------------------------------------
if __name__ == "__main__":
    # Small but vreg/MXU-aligned demo config (dims multiples of 128).
    config = dict(
        hidden_dim=128,
        embedding_dim=128,
        layers=2,
        u_input_dim=256,
        n_input_dim=128,
    )
    u_layers = config["layers"]
    n_layers = config["layers"]

    batch_users = 200    # padded to 256 -> 2 grid tiles of 128
    batch_nudges = 100   # padded to 128 -> lane-dense output stores

    key = jax.random.PRNGKey(0)
    k_up, k_np, k_ui, k_ni = jax.random.split(key, 4)

    user_params = init_tower(k_up, config["u_input_dim"], config["hidden_dim"],
                             config["embedding_dim"])
    nudge_params = init_tower(k_np, config["n_input_dim"], config["hidden_dim"],
                              config["embedding_dim"])

    user_input = jax.random.normal(
        k_ui, (batch_users, config["u_input_dim"]), jnp.float32)
    nudge_input = jax.random.normal(
        k_ni, (batch_nudges, config["n_input_dim"]), jnp.float32)

    scores = two_tower_forward(user_input, nudge_input, user_params,
                               nudge_params, u_layers, n_layers)
    scores = jax.block_until_ready(scores)

    ref = two_tower_ref(user_input, nudge_input, user_params, nudge_params,
                        u_layers, n_layers)
    assert scores.shape == (batch_users, batch_nudges)
    # bf16 MXU operands with f32 accumulation vs f32 reference -> loosened tol.
    assert jnp.allclose(scores, ref, atol=5e-2, rtol=5e-2), (
        float(jnp.max(jnp.abs(scores - ref))))

    print("KERNEL_OK")
</pallas_src>

<mosaic_0001>
module attributes {stable_mosaic.version = 11 : i64} {
  func.func @nudge_tower_kernel(%arg0: memref<128x128xf32, #tpu.memory_space<vmem>>, %arg1: memref<128x128xbf16, #tpu.memory_space<vmem>>, %arg2: memref<1x128xf32, #tpu.memory_space<vmem>>, %arg3: memref<128x128xbf16, #tpu.memory_space<vmem>>, %arg4: memref<1x128xf32, #tpu.memory_space<vmem>>, %arg5: memref<128x128xbf16, #tpu.memory_space<vmem>>, %arg6: memref<1x128xf32, #tpu.memory_space<vmem>>, %arg7: memref<128x128xbf16, #tpu.memory_space<vmem>>) attributes {dimension_semantics = [], scalar_prefetch = 0 : i64, scratch_operands = 0 : i64, tpu.core_type = #tpu.core_type<tc>} {
    %c0 = arith.constant 0 : index
    %c0_0 = arith.constant 0 : index
    %0 = vector.load %arg0[%c0, %c0_0] : memref<128x128xf32, #tpu.memory_space<vmem>>, vector<128x128xf32>
    %c0_1 = arith.constant 0 : index
    %c0_2 = arith.constant 0 : index
    %1 = vector.load %arg1[%c0_1, %c0_2] : memref<128x128xbf16, #tpu.memory_space<vmem>>, vector<128x128xbf16>
    %c0_3 = arith.constant 0 : index
    %c0_4 = arith.constant 0 : index
    %2 = vector.load %arg2[%c0_3, %c0_4] : memref<1x128xf32, #tpu.memory_space<vmem>>, vector<1x128xf32>
    %c0_5 = arith.constant 0 : index
    %c0_6 = arith.constant 0 : index
    %3 = vector.load %arg3[%c0_5, %c0_6] : memref<128x128xbf16, #tpu.memory_space<vmem>>, vector<128x128xbf16>
    %c0_7 = arith.constant 0 : index
    %c0_8 = arith.constant 0 : index
    %4 = vector.load %arg4[%c0_7, %c0_8] : memref<1x128xf32, #tpu.memory_space<vmem>>, vector<1x128xf32>
    %c0_9 = arith.constant 0 : index
    %c0_10 = arith.constant 0 : index
    %5 = vector.load %arg5[%c0_9, %c0_10] : memref<128x128xbf16, #tpu.memory_space<vmem>>, vector<128x128xbf16>
    %c0_11 = arith.constant 0 : index
    %c0_12 = arith.constant 0 : index
    %6 = vector.load %arg6[%c0_11, %c0_12] : memref<1x128xf32, #tpu.memory_space<vmem>>, vector<1x128xf32>
    %7 = vector.shape_cast %2 : vector<1x128xf32> to vector<1x128xf32>
    %8 = vector.broadcast %7 : vector<1x128xf32> to vector<128x128xf32>
    %9 = vector.shape_cast %4 : vector<1x128xf32> to vector<1x128xf32>
    %10 = vector.broadcast %9 : vector<1x128xf32> to vector<128x128xf32>
    %11 = vector.shape_cast %6 : vector<1x128xf32> to vector<1x128xf32>
    %12 = vector.broadcast %11 : vector<1x128xf32> to vector<128x128xf32>
    %13 = arith.truncf %0 : vector<128x128xf32> to vector<128x128xbf16>
    %cst = arith.constant dense<0.000000e+00> : vector<128x128xf32>
    %14 = tpu.matmul %13, %1, %cst {dimension_numbers = #tpu.dot_dimension_numbers<[1], [0], [0], [1], [0, 0, 1, 1], [], []>} : vector<128x128xbf16>, vector<128x128xbf16>, vector<128x128xf32> -> vector<128x128xf32>
    %15 = arith.addf %14, %8 : vector<128x128xf32>
    %cst_13 = arith.constant 0.000000e+00 : f32
    %16 = vector.broadcast %cst_13 : f32 to vector<128x128xf32>
    %17 = arith.maximumf %15, %16 : vector<128x128xf32>
    %18 = arith.truncf %17 : vector<128x128xf32> to vector<128x128xbf16>
    %cst_14 = arith.constant dense<0.000000e+00> : vector<128x128xf32>
    %19 = tpu.matmul %18, %3, %cst_14 {dimension_numbers = #tpu.dot_dimension_numbers<[1], [0], [0], [1], [0, 0, 1, 1], [], []>} : vector<128x128xbf16>, vector<128x128xbf16>, vector<128x128xf32> -> vector<128x128xf32>
    %20 = arith.addf %19, %10 : vector<128x128xf32>
    %cst_15 = arith.constant 0.000000e+00 : f32
    %21 = vector.broadcast %cst_15 : f32 to vector<128x128xf32>
    %22 = arith.maximumf %20, %21 : vector<128x128xf32>
    %23 = arith.truncf %22 : vector<128x128xf32> to vector<128x128xbf16>
    %cst_16 = arith.constant dense<0.000000e+00> : vector<128x128xf32>
    %24 = tpu.matmul %23, %3, %cst_16 {dimension_numbers = #tpu.dot_dimension_numbers<[1], [0], [0], [1], [0, 0, 1, 1], [], []>} : vector<128x128xbf16>, vector<128x128xbf16>, vector<128x128xf32> -> vector<128x128xf32>
    %25 = arith.addf %24, %10 : vector<128x128xf32>
    %cst_17 = arith.constant 0.000000e+00 : f32
    %26 = vector.broadcast %cst_17 : f32 to vector<128x128xf32>
    %27 = arith.maximumf %25, %26 : vector<128x128xf32>
    %28 = arith.truncf %27 : vector<128x128xf32> to vector<128x128xbf16>
    %cst_18 = arith.constant dense<0.000000e+00> : vector<128x128xf32>
    %29 = tpu.matmul %28, %5, %cst_18 {dimension_numbers = #tpu.dot_dimension_numbers<[1], [0], [0], [1], [0, 0, 1, 1], [], []>} : vector<128x128xbf16>, vector<128x128xbf16>, vector<128x128xf32> -> vector<128x128xf32>
    %30 = arith.addf %29, %12 : vector<128x128xf32>
    %31 = arith.truncf %30 : vector<128x128xf32> to vector<128x128xbf16>
    %c0_19 = arith.constant 0 : index
    %c0_20 = arith.constant 0 : index
    %32 = vector.load %arg7[%c0_19, %c0_20] : memref<128x128xbf16, #tpu.memory_space<vmem>>, vector<128x128xbf16>
    tpu.vector_store %arg7[%c0_19, %c0_20], %31 {strides = array<i32>} : memref<128x128xbf16, #tpu.memory_space<vmem>>, vector<128x128xbf16>,
    return
  }
}

</mosaic_0001>

<bundles_post_ra>
// kernel: tpu_custom_call.1
= control target key start
LH: loop header
LB: loop body
LE: loop exit
PB: predicated region body
PF: predicated region fallthrough
CT: control target
= control target key end

     0   :  { %12 = vsyncpa [#allocation3], 0  ;;  %s1499_s0 = inlined_call_operand.hbm [shape: f32[128,128], index: 0, kind: input, shape index: {}]   ;;  %s1500_s1 = inlined_call_operand.hbm [shape: bf16[128,128], index: 1, kind: input, shape index: {}]   ;;  %s1501_s2 = inlined_call_operand.vmem [shape: f32[1,128], index: 2, kind: input, shape index: {}]   ;;  %s1502_s3 = inlined_call_operand.hbm [shape: bf16[128,128], index: 3, kind: input, shape index: {}]   ;;  %s1503_s4 = inlined_call_operand.vmem [shape: f32[1,128], index: 4, kind: input, shape index: {}]   ;;  %s1504_s5 = inlined_call_operand.hbm [shape: bf16[128,128], index: 5, kind: input, shape index: {}]   ;;  %s1505_s6 = inlined_call_operand.vmem [shape: f32[1,128], index: 6, kind: input, shape index: {}]   ;;  %s1506_s7 = inlined_call_operand.hbm [shape: bf16[128,128], index: 7, kind: output, shape index: {}]  }
   0x1   :  { %13 = vsyncpa [#allocation6], 0 }
   0x2   :  { %14 = vsyncpa [#allocation9], 0 }
   0x3   :  { %15 = vsyncpa [#allocation4], 0  ;;  %s1328_s24 = smov [#allocation5]   ;;  %s1210_s28 = scalar_lea.hbm %s1500_s1, 1024 }
   0x4   :  { %s33_s25 = sshll.u32 %s1328_s24, 4  ;;  %p1211_p0 = scmp.ne.s32.totalorder %s1500_s1, %s1210_s28  ;;  %s34_s25 = int_to_ptr.vmem [resolvable:$true] %s33_s25 }
   0x5   :  { %p1214_p1 = scmp.lt.u32.totalorder %s1210_s28, %s1500_s1 }
   0x7   :  { %p1216_p2 = pnand %p1214_p1, %p1211_p0 }
   0x9   :  { %1219 = shalt.err (!%p1216_p2)
}
   0xa   :  { %s1220_s10 = scalar_lea.vmem %s34_s25, 1024  ;;  %p1225_p4 = scmp.lt.s32.totalorder %s34_s25, %s34_s25 }
   0xb   :  { %p1221_p3 = scmp.ne.s32.totalorder %s34_s25, %s1220_s10  ;;  %p1226_p5 = scmp.lt.s32.totalorder %s1220_s10, %s1220_s10 }
   0xd   :  { %p1227_p6 = por %p1226_p5, %p1225_p4 }
   0xf   :  { %p1228_p7 = pnand %p1227_p6, %p1221_p3 }
  0x11   :  { %1231 = shalt.err (!%p1228_p7)
}
  0x12   :  { %s1329_s11 = smov 64   ;;  %s1330_s12 = smov 4  }
  0x13   :  { %39 = dma.hbm_to_vmem [thread:$0]  %s1500_s1, 1024, %s34_s25, [#allocation6], %s1329_s11, %s1329_s11, %s1330_s12  }
  0x14   :  { %s1331_s15 = smov [#allocation2]   ;;  %s1232_s19 = scalar_lea.hbm %s1499_s0, 2048 }
  0x15   :  { %s21_s16 = sshll.u32 %s1331_s15, 4  ;;  %p1233_p8 = scmp.ne.s32.totalorder %s1499_s0, %s1232_s19  ;;  %s22_s16 = int_to_ptr.vmem [resolvable:$true] %s21_s16 }
  0x16   :  { %p1236_p9 = scmp.lt.u32.totalorder %s1232_s19, %s1499_s0 }
  0x18   :  { %p1238_p10 = pnand %p1236_p9, %p1233_p8 }
  0x1a   :  { %1241 = shalt.err (!%p1238_p10)
}
  0x1b   :  { %s1242_s24 = scalar_lea.vmem %s22_s16, 2048  ;;  %p1247_p12 = scmp.lt.s32.totalorder %s22_s16, %s22_s16 }
  0x1c   :  { %p1243_p11 = scmp.ne.s32.totalorder %s22_s16, %s1242_s24  ;;  %p1248_p13 = scmp.lt.s32.totalorder %s1242_s24, %s1242_s24 }
  0x1e   :  { %p1249_p0 = por %p1248_p13, %p1247_p12 }
  0x20   :  { %p1250_p1 = pnand %p1249_p0, %p1243_p11 }
  0x22   :  { %1253 = shalt.err (!%p1250_p1)
}
  0x23   :  { %s1332_s1 = smov 128   ;;  %s1333_s25 = smov 8  }
  0x24   :  { %27 = dma.hbm_to_vmem [thread:$0]  %s1499_s0, 2048, %s22_s16, [#allocation3], %s1332_s1, %s1332_s1, %s1333_s25  }
  0x25   :  { %s1334_s28 = smov [#allocation7]   ;;  %s1335_s30 = smov [#allocation8]  }
  0x26   :  { %s47_s29 = sshll.u32 %s1334_s28, 4  ;;  %s61_s8 = sshll.u32 %s1335_s30, 4  ;;  %s48_s29 = int_to_ptr.vmem [resolvable:$true] %s47_s29  ;;  %s1404_s8 = int_to_ptr.vmem [resolvable:$true] %s61_s8 }
  0x27   :  { %s1254_s13 = scalar_lea.hbm %s1502_s3, 1024 }
  0x28   :  { %p1255_p2 = scmp.ne.s32.totalorder %s1502_s3, %s1254_s13  ;;  %p1258_p3 = scmp.lt.u32.totalorder %s1254_s13, %s1502_s3 }
  0x2a   :  { %p1260_p4 = pnand %p1258_p3, %p1255_p2 }
  0x2c   :  { %1263 = shalt.err (!%p1260_p4)
}
  0x2d   :  { %s1264_s0 = scalar_lea.vmem %s48_s29, 1024  ;;  %p1269_p6 = scmp.lt.s32.totalorder %s48_s29, %s48_s29 }
  0x2e   :  { %p1265_p5 = scmp.ne.s32.totalorder %s48_s29, %s1264_s0  ;;  %p1270_p7 = scmp.lt.s32.totalorder %s1264_s0, %s1264_s0 }
  0x30   :  { %p1271_p8 = por %p1270_p7, %p1269_p6 }
  0x32   :  { %p1272_p9 = pnand %p1271_p8, %p1265_p5 }
  0x34   :  { %1275 = shalt.err (!%p1272_p9)
}
  0x35   :  { %53 = dma.hbm_to_vmem [thread:$0]  %s1502_s3, 1024, %s48_s29, [#allocation6], %s1329_s11, %s1329_s11, %s1330_s12  }
  0x36   :  { %s1276_s22 = scalar_lea.hbm %s1504_s5, 1024 }
  0x37   :  { %p1277_p10 = scmp.ne.s32.totalorder %s1504_s5, %s1276_s22  ;;  %p1280_p11 = scmp.lt.u32.totalorder %s1276_s22, %s1504_s5 }
  0x39   :  { %p1282_p12 = pnand %p1280_p11, %p1277_p10 }
  0x3b   :  { %1285 = shalt.err (!%p1282_p12)
}
  0x3c   :  { %s1286_s26 = scalar_lea.vmem %s1404_s8, 1024  ;;  %p1291_p0 = scmp.lt.s32.totalorder %s1404_s8, %s1404_s8 }
  0x3d   :  { %p1287_p13 = scmp.ne.s32.totalorder %s1404_s8, %s1286_s26  ;;  %p1292_p1 = scmp.lt.s32.totalorder %s1286_s26, %s1286_s26 }
  0x3f   :  { %p1293_p2 = por %p1292_p1, %p1291_p0 }
  0x41   :  { %p1294_p3 = pnand %p1293_p2, %p1287_p13 }
  0x43   :  { %1297 = shalt.err (!%p1294_p3)
}
  0x44   :  { %67 = dma.hbm_to_vmem [thread:$0]  %s1504_s5, 1024, %s1404_s8, [#allocation9], %s1329_s11, %s1329_s11, %s1330_s12  }
  0x45   :  { %1320 = dma.done.wait [#allocation3], 2048  }
  0x46   :  { %1321 = vsyncadd [#allocation3], 4294965248 }
  0x47   :  { %1322 = dma.done.wait [#allocation6], 2048  }
  0x48   :  { %1323 = vsyncadd [#allocation6], 4294965248 }
  0x49   :  { %1324 = dma.done.wait [#allocation9], 1024  }
  0x4a   :  { %1325 = vsyncadd [#allocation9], 4294966272  ;;  %v1186_v0 = vld [vmem:[#allocation5] sm:$0xff]   ;;  %v1187_v1 = vld [vmem:[#allocation5 + $0x8] sm:$0xff]  }
  0x4b   :  { %1049 = vmatprep.subr.bf16.mxu0 %v1186_v0  ;;  %v1188_v2 = vld [vmem:[#allocation5 + $0x10] sm:$0xff]   ;;  %v1189_v3 = vld [vmem:[#allocation5 + $0x18] sm:$0xff]   ;;  %v83_v4 = vld [vmem:[#allocation2] sm:$0xff] }
  0x4c   :  { %1050 = vmatpush3.bf16.msra.mxu0 %v1186_v0  ;;  %v84_v5 = vld [vmem:[#allocation2 + $0x8] sm:$0xff]  ;;  %v1190_v7 = vld [vmem:[#allocation5 + $0x20] sm:$0xff]   ;;  %v1196_v11 = vld [vmem:[#allocation7 + $0x10] sm:$0xff]  }
  0x4d   :  { %1051 = vmatprep.subr.bf16.mxu0 %v1187_v1  ;;  %v168_v6 = vpack.c.bf16 %v84_v5, %v83_v4  ;;  %v1194_v8 = vld [vmem:[#allocation7] sm:$0xff]   ;;  %v1195_v9 = vld [vmem:[#allocation7 + $0x8] sm:$0xff]   ;;  %v1192_v12 = vld [vmem:[#allocation5 + $0x30] sm:$0xff]  }
  0x4e   :  { %v1191_v10 = vld [vmem:[#allocation5 + $0x28] sm:$0xff]   ;;  %1081 = vmatprep.subr.bf16.mxu1 %v1194_v8  ;;  %v1197_v13 = vld [vmem:[#allocation7 + $0x18] sm:$0xff]   ;;  %v1198_v15 = vld [vmem:[#allocation7 + $0x20] sm:$0xff]  }
  0x4f   :  { %1065 = vmatprep.mubr.bf16.mxu0 %v168_v6  ;;  %1082 = vmatpush3.bf16.msra.mxu1 %v1194_v8  ;;  %v1193_v14 = vld [vmem:[#allocation5 + $0x38] sm:$0xff]   ;;  %v85_v16 = vld [vmem:[#allocation2 + $0x10] sm:$0xff]  ;;  %v87_v18 = vld [vmem:[#allocation2 + $0x20] sm:$0xff] }
  0x50   :  { %1052 = vmatpush3.bf16.msra.mxu0 %v1187_v1  ;;  %1083 = vmatprep.subr.bf16.mxu1 %v1195_v9  ;;  %v86_v17 = vld [vmem:[#allocation2 + $0x18] sm:$0xff]  ;;  %v88_v19 = vld [vmem:[#allocation2 + $0x28] sm:$0xff]  ;;  %v89_v23 = vld [vmem:[#allocation2 + $0x30] sm:$0xff] }
  0x51   :  { %1053 = vmatprep.subr.bf16.mxu0 %v1188_v2  ;;  %v169_v20 = vpack.c.bf16 %v86_v17, %v85_v16  ;;  %v1199_v21 = vld [vmem:[#allocation7 + $0x28] sm:$0xff]   ;;  %v170_v22 = vpack.c.bf16 %v88_v19, %v87_v18  ;;  %v90_v24 = vld [vmem:[#allocation2 + $0x38] sm:$0xff]  ;;  %v91_v25 = vld [vmem:[#allocation2 + $0x40] sm:$0xff] }
  0x52   :  { %v92_v26 = vld [vmem:[#allocation2 + $0x48] sm:$0xff]  ;;  %v171_v27 = vpack.c.bf16 %v90_v24, %v89_v23  ;;  %v93_v29 = vld [vmem:[#allocation2 + $0x50] sm:$0xff]  ;;  %v94_v30 = vld [vmem:[#allocation2 + $0x58] sm:$0xff] }
  0x53   :  { %1084 = vmatpush3.bf16.msra.mxu1 %v1195_v9  ;;  %v172_v28 = vpack.c.bf16 %v92_v26, %v91_v25  ;;  %v95_v31 = vld [vmem:[#allocation2 + $0x60] sm:$0xff]  ;;  %v96_v32 = vld [vmem:[#allocation2 + $0x68] sm:$0xff]  ;;  %v173_v33 = vpack.c.bf16 %v94_v30, %v93_v29  ;;  %v97_v35 = vld [vmem:[#allocation2 + $0x70] sm:$0xff] }
  0x54   :  { %1054 = vmatpush3.bf16.msra.mxu0 %v1188_v2  ;;  %1085 = vmatprep.subr.bf16.mxu1 %v1196_v11  ;;  %v174_v34 = vpack.c.bf16 %v96_v32, %v95_v31  ;;  %v98_v36 = vld [vmem:[#allocation2 + $0x78] sm:$0xff]  ;;  %v1200_v38 = vld [vmem:[#allocation7 + $0x30] sm:$0xff]   ;;  %v879_v40 = vld [vmem:[%s1501_s2] ss:$0 sm:$0xff] }
  0x55   :  { %1055 = vmatprep.subr.bf16.mxu0 %v1189_v3  ;;  %v175_v37 = vpack.c.bf16 %v98_v36, %v97_v35  ;;  %v1201_v39 = vld [vmem:[#allocation7 + $0x38] sm:$0xff]   ;;  %v1204_v35 = vld [vmem:[#allocation8 + $0x10] sm:$0xff]  }
  0x56   :  { %v1205_v36 = vld [vmem:[#allocation8 + $0x18] sm:$0xff]  }
  0x57   :  { %1086 = vmatpush3.bf16.msra.mxu1 %v1196_v11 }
  0x58   :  { %1056 = vmatpush3.bf16.msra.mxu0 %v1189_v3  ;;  %1087 = vmatprep.subr.bf16.mxu1 %v1197_v13 }
  0x59   :  { %1057 = vmatprep.subr.bf16.mxu0 %v1190_v7 }
  0x5b   :  { %1088 = vmatpush3.bf16.msra.mxu1 %v1197_v13 }
  0x5c   :  { %1058 = vmatpush3.bf16.msra.mxu0 %v1190_v7  ;;  %1089 = vmatprep.subr.bf16.mxu1 %v1198_v15 }
  0x5d   :  { %1059 = vmatprep.subr.bf16.mxu0 %v1191_v10 }
  0x5f   :  { %1090 = vmatpush3.bf16.msra.mxu1 %v1198_v15 }
  0x60   :  { %1060 = vmatpush3.bf16.msra.mxu0 %v1191_v10  ;;  %1091 = vmatprep.subr.bf16.mxu1 %v1199_v21 }
  0x61   :  { %1061 = vmatprep.subr.bf16.mxu0 %v1192_v12 }
  0x63   :  { %1092 = vmatpush3.bf16.msra.mxu1 %v1199_v21 }
  0x64   :  { %1062 = vmatpush3.bf16.msra.mxu0 %v1192_v12  ;;  %1093 = vmatprep.subr.bf16.mxu1 %v1200_v38 }
  0x65   :  { %1063 = vmatprep.subr.bf16.mxu0 %v1193_v14 }
  0x67   :  { %1094 = vmatpush3.bf16.msra.mxu1 %v1200_v38 }
  0x68   :  { %1064 = vmatpush3.bf16.msra.mxu0 %v1193_v14  ;;  %1095 = vmatprep.subr.bf16.mxu1 %v1201_v39 }
  0x69   :  { %1113 = vmatprep.subr.bf16.mxu0 %v1194_v8 }
  0x6b   :  { %1066 = vmatmul.mubr.bf16.vlgmr.msra.gmra.mrb[0].mxu0 %v169_v20  ;;  %1096 = vmatpush3.bf16.msra.mxu1 %v1201_v39 }
  0x6c   :  { %1069 = vmatprep.mubr.bf16.mxu0 %v170_v22  ;;  %1114 = vmatpush3.bf16.msra.mxu0 %v1194_v8 }
  0x6d   :  { %1115 = vmatprep.subr.bf16.mxu0 %v1195_v9 }
  0x70   :  { %1116 = vmatpush3.bf16.msra.mxu0 %v1195_v9 }
  0x71   :  { %1117 = vmatprep.subr.bf16.mxu0 %v1196_v11 }
  0x73   :  { %1070 = vmatmul.mubr.bf16.gmra.mrb[4].mxu0 %v171_v27 }
  0x74   :  { %1073 = vmatprep.mubr.bf16.mxu0 %v172_v28  ;;  %1118 = vmatpush3.bf16.msra.mxu0 %v1196_v11 }
  0x75   :  { %1119 = vmatprep.subr.bf16.mxu0 %v1197_v13 }
  0x78   :  { %1120 = vmatpush3.bf16.msra.mxu0 %v1197_v13 }
  0x79   :  { %1121 = vmatprep.subr.bf16.mxu0 %v1198_v15 }
  0x7b   :  { %1074 = vmatmul.mubr.bf16.gmra.mrb[8].mxu0 %v173_v33  ;;  %v1202_v33 = vld [vmem:[#allocation8] sm:$0xff]  }
  0x7c   :  { %1077 = vmatprep.mubr.bf16.mxu0 %v174_v34  ;;  %1122 = vmatpush3.bf16.msra.mxu0 %v1198_v15  ;;  %v1203_v34 = vld [vmem:[#allocation8 + $0x8] sm:$0xff]  }
  0x7d   :  { %1123 = vmatprep.subr.bf16.mxu0 %v1199_v21  ;;  %1145 = vmatprep.subr.bf16.mxu1 %v1202_v33 }
  0x80   :  { %1124 = vmatpush3.bf16.msra.mxu0 %v1199_v21 }
  0x81   :  { %1125 = vmatprep.subr.bf16.mxu0 %v1200_v38 }
  0x83   :  { %1078 = vmatmul.mubr.bf16.gmra.mrb[12].mxu0 %v175_v37  ;;  %v1206_v37 = vld [vmem:[#allocation8 + $0x20] sm:$0xff]  }
  0x84   :  { %1126 = vmatpush3.bf16.msra.mxu0 %v1200_v38  ;;  %v1207_v38 = vld [vmem:[#allocation8 + $0x28] sm:$0xff]  }
  0x85   :  { %1127 = vmatprep.subr.bf16.mxu0 %v1201_v39 }
  0x88   :  { %1128 = vmatpush3.bf16.msra.mxu0 %v1201_v39  ;;  %v1447_v39 = vld [vmem:[%s1503_s4] ss:$0 sm:$0xff] }
 0x13e   :  { %v1067_v41 = vpop.f32.mrb[0].mxu0 }
 0x13f   :  { %v267_v42 = vadd.f32 %v1067_v41, %v879_v40  ;;  %v258_v43 = vpop.f32.mrb[1].mxu0 }
 0x140   :  { %v259_v44 = vadd.f32 %v879_v40, %v258_v43  ;;  %v1068_v45 = vpop.f32.mrb[2].mxu0 }
 0x141   :  { %v270_v46 = vadd.f32 %v1068_v45, %v879_v40  ;;  %v261_v47 = vpop.f32.mrb[3].mxu0  ;;  %v323_v49 = vmax.f32 %v267_v42, 0.0 }
 0x142   :  { %v262_v48 = vadd.f32 %v879_v40, %v261_v47  ;;  %v321_v51 = vmax.f32 %v259_v44, 0.0 }
 0x143   :  { %v324_v50 = vmax.f32 %v270_v46, 0.0 }
 0x144   :  { %v322_v52 = vmax.f32 %v262_v48, 0.0 }
 0x145   :  { %v338_v53 = vpack.c.bf16 %v324_v50, %v323_v49 }
 0x146   :  { %v1071_v54 = vpop.f32.mrb[4].mxu0  ;;  %v337_v55 = vpack.c.bf16 %v322_v52, %v321_v51 }
 0x147   :  { %v283_v56 = vadd.f32 %v1071_v54, %v879_v40  ;;  %v274_v57 = vpop.f32.mrb[5].mxu0 }
 0x148   :  { %v275_v58 = vadd.f32 %v879_v40, %v274_v57  ;;  %v1072_v59 = vpop.f32.mrb[6].mxu0  ;;  %1097 = vmatprep.mubr.bf16.mxu1 %v337_v55 }
 0x149   :  { %v286_v60 = vadd.f32 %v1072_v59, %v879_v40  ;;  %v277_v61 = vpop.f32.mrb[7].mxu0  ;;  %1098 = vmatmul.mubr.bf16.vlgmr.msra.gmra.mrb[0].mxu1 %v338_v53  ;;  %v327_v63 = vmax.f32 %v283_v56, 0.0 }
 0x14a   :  { %v278_v62 = vadd.f32 %v879_v40, %v277_v61  ;;  %v325_v1 = vmax.f32 %v275_v58, 0.0  ;;  %1146 = vmatpush3.bf16.msra.mxu1 %v1202_v33  ;;  %v1209_v33 = vld [vmem:[#allocation8 + $0x38] sm:$0xff]  }
 0x14b   :  { %v328_v0 = vmax.f32 %v286_v60, 0.0  ;;  %1147 = vmatprep.subr.bf16.mxu1 %v1203_v34 }
 0x14c   :  { %v326_v2 = vmax.f32 %v278_v62, 0.0 }
 0x14d   :  { %v340_v3 = vpack.c.bf16 %v328_v0, %v327_v63 }
 0x14e   :  { %v339_v4 = vpack.c.bf16 %v326_v2, %v325_v1  ;;  %v1075_v5 = vpop.f32.mrb[8].mxu0  ;;  %1148 = vmatpush3.bf16.msra.mxu1 %v1203_v34 }
 0x14f   :  { %v299_v6 = vadd.f32 %v1075_v5, %v879_v40  ;;  %v290_v7 = vpop.f32.mrb[9].mxu0  ;;  %1149 = vmatprep.subr.bf16.mxu1 %v1204_v35 }
 0x150   :  { %v291_v8 = vadd.f32 %v879_v40, %v290_v7  ;;  %v1076_v9 = vpop.f32.mrb[10].mxu0  ;;  %1101 = vmatprep.mubr.bf16.mxu1 %v339_v4 }
 0x151   :  { %v302_v10 = vadd.f32 %v1076_v9, %v879_v40  ;;  %v293_v11 = vpop.f32.mrb[11].mxu0  ;;  %1102 = vmatmul.mubr.bf16.gmra.mrb[4].mxu1 %v340_v3  ;;  %v331_v13 = vmax.f32 %v299_v6, 0.0 }
 0x152   :  { %v294_v12 = vadd.f32 %v879_v40, %v293_v11  ;;  %v329_v15 = vmax.f32 %v291_v8, 0.0  ;;  %1150 = vmatpush3.bf16.msra.mxu1 %v1204_v35 }
 0x153   :  { %v332_v14 = vmax.f32 %v302_v10, 0.0  ;;  %1151 = vmatprep.subr.bf16.mxu1 %v1205_v36 }
 0x154   :  { %v330_v16 = vmax.f32 %v294_v12, 0.0 }
 0x155   :  { %v342_v17 = vpack.c.bf16 %v332_v14, %v331_v13 }
 0x156   :  { %v341_v18 = vpack.c.bf16 %v330_v16, %v329_v15  ;;  %v1079_v19 = vpop.f32.mrb[12].mxu0  ;;  %1152 = vmatpush3.bf16.msra.mxu1 %v1205_v36 }
 0x157   :  { %v315_v20 = vadd.f32 %v1079_v19, %v879_v40  ;;  %v306_v21 = vpop.f32.mrb[13].mxu0  ;;  %1153 = vmatprep.subr.bf16.mxu1 %v1206_v37 }
 0x158   :  { %v307_v22 = vadd.f32 %v879_v40, %v306_v21  ;;  %v1080_v23 = vpop.f32.mrb[14].mxu0  ;;  %1105 = vmatprep.mubr.bf16.mxu1 %v341_v18 }
 0x159   :  { %v318_v24 = vadd.f32 %v1080_v23, %v879_v40  ;;  %v309_v25 = vpop.f32.mrb[15].mxu0  ;;  %1106 = vmatmul.mubr.bf16.gmra.mrb[8].mxu1 %v342_v17  ;;  %v335_v27 = vmax.f32 %v315_v20, 0.0 }
 0x15a   :  { %v310_v26 = vadd.f32 %v879_v40, %v309_v25  ;;  %v333_v29 = vmax.f32 %v307_v22, 0.0  ;;  %1154 = vmatpush3.bf16.msra.mxu1 %v1206_v37 }
 0x15b   :  { %v336_v28 = vmax.f32 %v318_v24, 0.0  ;;  %1155 = vmatprep.subr.bf16.mxu1 %v1207_v38 }
 0x15c   :  { %v334_v30 = vmax.f32 %v310_v26, 0.0 }
 0x15d   :  { %v344_v31 = vpack.c.bf16 %v336_v28, %v335_v27 }
 0x15e   :  { %v343_v32 = vpack.c.bf16 %v334_v30, %v333_v29  ;;  %1156 = vmatpush3.bf16.msra.mxu1 %v1207_v38 }
 0x160   :  { %1109 = vmatprep.mubr.bf16.mxu1 %v343_v32  ;;  %v1208_v32 = vld [vmem:[#allocation8 + $0x30] sm:$0xff]  }
 0x161   :  { %1110 = vmatmul.mubr.bf16.gmra.mrb[12].mxu1 %v344_v31  ;;  %1157 = vmatprep.subr.bf16.mxu1 %v1208_v32 }
 0x162   :  { %1158 = vmatpush3.bf16.msra.mxu1 %v1208_v32 }
 0x163   :  { %1159 = vmatprep.subr.bf16.mxu1 %v1209_v33 }
 0x166   :  { %1160 = vmatpush3.bf16.msra.mxu1 %v1209_v33 }
 0x21c   :  { %v1099_v40 = vpop.f32.mrb[0].mxu1 }
 0x21d   :  { %v436_v41 = vadd.f32 %v1099_v40, %v1447_v39  ;;  %v427_v42 = vpop.f32.mrb[1].mxu1 }
 0x21e   :  { %v428_v43 = vadd.f32 %v1447_v39, %v427_v42  ;;  %v1100_v44 = vpop.f32.mrb[2].mxu1 }
 0x21f   :  { %v439_v45 = vadd.f32 %v1100_v44, %v1447_v39  ;;  %v430_v46 = vpop.f32.mrb[3].mxu1  ;;  %v492_v48 = vmax.f32 %v436_v41, 0.0 }
 0x220   :  { %v431_v47 = vadd.f32 %v1447_v39, %v430_v46  ;;  %v490_v50 = vmax.f32 %v428_v43, 0.0 }
 0x221   :  { %v493_v49 = vmax.f32 %v439_v45, 0.0 }
 0x222   :  { %v491_v51 = vmax.f32 %v431_v47, 0.0 }
 0x223   :  { %v507_v52 = vpack.c.bf16 %v493_v49, %v492_v48 }
 0x224   :  { %v506_v53 = vpack.c.bf16 %v491_v51, %v490_v50  ;;  %v1103_v54 = vpop.f32.mrb[4].mxu1 }
 0x225   :  { %v452_v55 = vadd.f32 %v1103_v54, %v1447_v39  ;;  %v443_v56 = vpop.f32.mrb[5].mxu1 }
 0x226   :  { %v444_v57 = vadd.f32 %v1447_v39, %v443_v56  ;;  %v1104_v58 = vpop.f32.mrb[6].mxu1  ;;  %1129 = vmatprep.mubr.bf16.mxu0 %v506_v53 }
 0x227   :  { %v455_v59 = vadd.f32 %v1104_v58, %v1447_v39  ;;  %v446_v60 = vpop.f32.mrb[7].mxu1  ;;  %1130 = vmatmul.mubr.bf16.vlgmr.msra.gmra.mrb[16].mxu0 %v507_v52  ;;  %v496_v62 = vmax.f32 %v452_v55, 0.0 }
 0x228   :  { %v447_v61 = vadd.f32 %v1447_v39, %v446_v60  ;;  %v494_v0 = vmax.f32 %v444_v57, 0.0 }
 0x229   :  { %v497_v63 = vmax.f32 %v455_v59, 0.0 }
 0x22a   :  { %v495_v1 = vmax.f32 %v447_v61, 0.0 }
 0x22b   :  { %v509_v2 = vpack.c.bf16 %v497_v63, %v496_v62 }
 0x22c   :  { %v508_v3 = vpack.c.bf16 %v495_v1, %v494_v0  ;;  %v1107_v4 = vpop.f32.mrb[8].mxu1 }
 0x22d   :  { %v468_v5 = vadd.f32 %v1107_v4, %v1447_v39  ;;  %v459_v6 = vpop.f32.mrb[9].mxu1 }
 0x22e   :  { %v460_v7 = vadd.f32 %v1447_v39, %v459_v6  ;;  %v1108_v8 = vpop.f32.mrb[10].mxu1  ;;  %1133 = vmatprep.mubr.bf16.mxu0 %v508_v3 }
 0x22f   :  { %v471_v9 = vadd.f32 %v1108_v8, %v1447_v39  ;;  %v462_v10 = vpop.f32.mrb[11].mxu1  ;;  %1134 = vmatmul.mubr.bf16.gmra.mrb[20].mxu0 %v509_v2  ;;  %v500_v12 = vmax.f32 %v468_v5, 0.0 }
 0x230   :  { %v463_v11 = vadd.f32 %v1447_v39, %v462_v10  ;;  %v498_v14 = vmax.f32 %v460_v7, 0.0 }
 0x231   :  { %v501_v13 = vmax.f32 %v471_v9, 0.0 }
 0x232   :  { %v499_v15 = vmax.f32 %v463_v11, 0.0 }
 0x233   :  { %v511_v16 = vpack.c.bf16 %v501_v13, %v500_v12 }
 0x234   :  { %v510_v17 = vpack.c.bf16 %v499_v15, %v498_v14  ;;  %v1111_v18 = vpop.f32.mrb[12].mxu1 }
 0x235   :  { %v484_v19 = vadd.f32 %v1111_v18, %v1447_v39  ;;  %v475_v20 = vpop.f32.mrb[13].mxu1 }
 0x236   :  { %v476_v21 = vadd.f32 %v1447_v39, %v475_v20  ;;  %v1112_v22 = vpop.f32.mrb[14].mxu1  ;;  %1137 = vmatprep.mubr.bf16.mxu0 %v510_v17 }
 0x237   :  { %v487_v23 = vadd.f32 %v1112_v22, %v1447_v39  ;;  %v478_v24 = vpop.f32.mrb[15].mxu1  ;;  %1138 = vmatmul.mubr.bf16.gmra.mrb[24].mxu0 %v511_v16  ;;  %v504_v26 = vmax.f32 %v484_v19, 0.0 }
 0x238   :  { %v479_v25 = vadd.f32 %v1447_v39, %v478_v24  ;;  %v502_v28 = vmax.f32 %v476_v21, 0.0 }
 0x239   :  { %v505_v27 = vmax.f32 %v487_v23, 0.0 }
 0x23a   :  { %v503_v29 = vmax.f32 %v479_v25, 0.0 }
 0x23b   :  { %v513_v30 = vpack.c.bf16 %v505_v27, %v504_v26 }
 0x23c   :  { %v512_v31 = vpack.c.bf16 %v503_v29, %v502_v28  ;;  %v881_v28 = vld [vmem:[%s1505_s6] ss:$0 sm:$0xff]  ;;  %s1336_s6 = smov [#allocation10]  }
 0x23d   :  { %s865_s8 = sshll.u32 %s1336_s6, 4  ;;  %s866_s8 = int_to_ptr.vmem [resolvable:$true] %s865_s8 }
 0x23e   :  { %1141 = vmatprep.mubr.bf16.mxu0 %v512_v31  ;;  %s1298_s9 = scalar_lea.vmem %s866_s8, 1024  ;;  %p1303_p5 = scmp.lt.s32.totalorder %s866_s8, %s866_s8 }
 0x23f   :  { %1142 = vmatmul.mubr.bf16.gmra.mrb[28].mxu0 %v513_v30  ;;  %p1299_p4 = scmp.ne.s32.totalorder %s866_s8, %s1298_s9  ;;  %p1304_p6 = scmp.lt.s32.totalorder %s1298_s9, %s1298_s9 }
 0x241   :  { %p1305_p7 = por %p1304_p6, %p1303_p5 }
 0x243   :  { %p1306_p8 = pnand %p1305_p7, %p1299_p4 }
 0x2fa   :  { %v1131_v34 = vpop.f32.mrb[16].mxu0 }
 0x2fb   :  { %v557_v35 = vadd.f32 %v1131_v34, %v1447_v39  ;;  %v548_v36 = vpop.f32.mrb[17].mxu0 }
 0x2fc   :  { %v549_v37 = vadd.f32 %v1447_v39, %v548_v36  ;;  %v1132_v38 = vpop.f32.mrb[18].mxu0 }
 0x2fd   :  { %v560_v40 = vadd.f32 %v1132_v38, %v1447_v39  ;;  %v551_v41 = vpop.f32.mrb[19].mxu0  ;;  %v613_v43 = vmax.f32 %v557_v35, 0.0 }
 0x2fe   :  { %v552_v42 = vadd.f32 %v1447_v39, %v551_v41  ;;  %v611_v45 = vmax.f32 %v549_v37, 0.0 }
 0x2ff   :  { %v614_v44 = vmax.f32 %v560_v40, 0.0 }
 0x300   :  { %v612_v46 = vmax.f32 %v552_v42, 0.0 }
 0x301   :  { %v628_v47 = vpack.c.bf16 %v614_v44, %v613_v43 }
 0x302   :  { %v627_v48 = vpack.c.bf16 %v612_v46, %v611_v45  ;;  %v1135_v49 = vpop.f32.mrb[20].mxu0 }
 0x303   :  { %v573_v50 = vadd.f32 %v1135_v49, %v1447_v39  ;;  %v564_v51 = vpop.f32.mrb[21].mxu0 }
 0x304   :  { %v565_v52 = vadd.f32 %v1447_v39, %v564_v51  ;;  %v1136_v53 = vpop.f32.mrb[22].mxu0  ;;  %1161 = vmatprep.mubr.bf16.mxu1 %v627_v48 }
 0x305   :  { %v576_v54 = vadd.f32 %v1136_v53, %v1447_v39  ;;  %v567_v55 = vpop.f32.mrb[23].mxu0  ;;  %1162 = vmatmul.mubr.bf16.vlgmr.msra.gmra.mrb[16].mxu1 %v628_v47  ;;  %v617_v57 = vmax.f32 %v573_v50, 0.0 }
 0x306   :  { %v568_v56 = vadd.f32 %v1447_v39, %v567_v55  ;;  %v615_v59 = vmax.f32 %v565_v52, 0.0 }
 0x307   :  { %v618_v58 = vmax.f32 %v576_v54, 0.0 }
 0x308   :  { %v616_v60 = vmax.f32 %v568_v56, 0.0 }
 0x309   :  { %v630_v61 = vpack.c.bf16 %v618_v58, %v617_v57 }
 0x30a   :  { %v629_v62 = vpack.c.bf16 %v616_v60, %v615_v59  ;;  %v1139_v63 = vpop.f32.mrb[24].mxu0 }
 0x30b   :  { %v589_v0 = vadd.f32 %v1139_v63, %v1447_v39  ;;  %v580_v1 = vpop.f32.mrb[25].mxu0 }
 0x30c   :  { %v581_v2 = vadd.f32 %v1447_v39, %v580_v1  ;;  %v1140_v3 = vpop.f32.mrb[26].mxu0  ;;  %1165 = vmatprep.mubr.bf16.mxu1 %v629_v62 }
 0x30d   :  { %v592_v4 = vadd.f32 %v1140_v3, %v1447_v39  ;;  %v583_v5 = vpop.f32.mrb[27].mxu0  ;;  %1166 = vmatmul.mubr.bf16.gmra.mrb[20].mxu1 %v630_v61  ;;  %v621_v7 = vmax.f32 %v589_v0, 0.0 }
 0x30e   :  { %v584_v6 = vadd.f32 %v1447_v39, %v583_v5  ;;  %v619_v9 = vmax.f32 %v581_v2, 0.0 }
 0x30f   :  { %v622_v8 = vmax.f32 %v592_v4, 0.0 }
 0x310   :  { %v620_v10 = vmax.f32 %v584_v6, 0.0 }
 0x311   :  { %v632_v11 = vpack.c.bf16 %v622_v8, %v621_v7 }
 0x312   :  { %v631_v12 = vpack.c.bf16 %v620_v10, %v619_v9  ;;  %v1143_v13 = vpop.f32.mrb[28].mxu0 }
 0x313   :  { %v605_v14 = vadd.f32 %v1143_v13, %v1447_v39  ;;  %v596_v15 = vpop.f32.mrb[29].mxu0 }
 0x314   :  { %v597_v16 = vadd.f32 %v1447_v39, %v596_v15  ;;  %v1144_v17 = vpop.f32.mrb[30].mxu0  ;;  %1169 = vmatprep.mubr.bf16.mxu1 %v631_v12 }
 0x315   :  { %v608_v18 = vadd.f32 %v1144_v17, %v1447_v39  ;;  %v599_v19 = vpop.f32.mrb[31].mxu0  ;;  %1170 = vmatmul.mubr.bf16.gmra.mrb[24].mxu1 %v632_v11  ;;  %v625_v21 = vmax.f32 %v605_v14, 0.0 }
 0x316   :  { %v600_v20 = vadd.f32 %v1447_v39, %v599_v19  ;;  %v623_v23 = vmax.f32 %v597_v16, 0.0 }
 0x317   :  { %v626_v22 = vmax.f32 %v608_v18, 0.0 }
 0x318   :  { %v624_v24 = vmax.f32 %v600_v20, 0.0 }
 0x319   :  { %v634_v25 = vpack.c.bf16 %v626_v22, %v625_v21 }
 0x31a   :  { %v633_v26 = vpack.c.bf16 %v624_v24, %v623_v23 }
 0x31c   :  { %1173 = vmatprep.mubr.bf16.mxu1 %v633_v26 }
 0x31d   :  { %1174 = vmatmul.mubr.bf16.gmra.mrb[28].mxu1 %v634_v25 }
 0x3d8   :  { %v1163_v27 = vpop.f32.mrb[16].mxu1 }
 0x3d9   :  { %v717_v29 = vpop.f32.mrb[17].mxu1  ;;  %v726_v31 = vadd.f32 %v1163_v27, %v881_v28 }
 0x3da   :  { %v1164_v30 = vpop.f32.mrb[18].mxu1  ;;  %v718_v34 = vadd.f32 %v881_v28, %v717_v29 }
 0x3db   :  { %v729_v32 = vadd.f32 %v1164_v30, %v881_v28  ;;  %v720_v33 = vpop.f32.mrb[19].mxu1 }
 0x3dc   :  { %v721_v39 = vadd.f32 %v881_v28, %v720_v33 }
 0x3dd   :  { %v946_v35 = vpack.c.bf16 %v729_v32, %v726_v31 }
 0x3de   :  { %v941_v36 = vpack.c.bf16 %v721_v39, %v718_v34 }
 0x3df   :  { %978 = vst [vmem:[#allocation10 + $0x8] sm:$0xff] %v946_v35  }
 0x3e0   :  { %942 = vst [vmem:[#allocation10] sm:$0xff] %v941_v36   ;;  %v1167_v37 = vpop.f32.mrb[20].mxu1 }
 0x3e1   :  { %v733_v38 = vpop.f32.mrb[21].mxu1  ;;  %v742_v41 = vadd.f32 %v1167_v37, %v881_v28 }
 0x3e2   :  { %v1168_v40 = vpop.f32.mrb[22].mxu1  ;;  %v734_v44 = vadd.f32 %v881_v28, %v733_v38 }
 0x3e3   :  { %v745_v42 = vadd.f32 %v1168_v40, %v881_v28  ;;  %v736_v43 = vpop.f32.mrb[23].mxu1 }
 0x3e4   :  { %v737_v45 = vadd.f32 %v881_v28, %v736_v43 }
 0x3e5   :  { %v956_v46 = vpack.c.bf16 %v745_v42, %v742_v41 }
 0x3e6   :  { %v951_v47 = vpack.c.bf16 %v737_v45, %v734_v44 }
 0x3e7   :  { %980 = vst [vmem:[#allocation10 + $0x18] sm:$0xff] %v956_v46  }
 0x3e8   :  { %979 = vst [vmem:[#allocation10 + $0x10] sm:$0xff] %v951_v47   ;;  %v1171_v48 = vpop.f32.mrb[24].mxu1 }
 0x3e9   :  { %v749_v49 = vpop.f32.mrb[25].mxu1  ;;  %v758_v51 = vadd.f32 %v1171_v48, %v881_v28 }
 0x3ea   :  { %v1172_v50 = vpop.f32.mrb[26].mxu1  ;;  %v750_v54 = vadd.f32 %v881_v28, %v749_v49 }
 0x3eb   :  { %v761_v52 = vadd.f32 %v1172_v50, %v881_v28  ;;  %v752_v53 = vpop.f32.mrb[27].mxu1 }
 0x3ec   :  { %v753_v55 = vadd.f32 %v881_v28, %v752_v53 }
 0x3ed   :  { %v966_v56 = vpack.c.bf16 %v761_v52, %v758_v51 }
 0x3ee   :  { %v961_v57 = vpack.c.bf16 %v753_v55, %v750_v54 }
 0x3ef   :  { %982 = vst [vmem:[#allocation10 + $0x28] sm:$0xff] %v966_v56  }
 0x3f0   :  { %981 = vst [vmem:[#allocation10 + $0x20] sm:$0xff] %v961_v57   ;;  %v1175_v58 = vpop.f32.mrb[28].mxu1 }
 0x3f1   :  { %v765_v59 = vpop.f32.mrb[29].mxu1  ;;  %v774_v61 = vadd.f32 %v1175_v58, %v881_v28 }
 0x3f2   :  { %v1176_v60 = vpop.f32.mrb[30].mxu1  ;;  %v766_v0 = vadd.f32 %v881_v28, %v765_v59 }
 0x3f3   :  { %v777_v62 = vadd.f32 %v1176_v60, %v881_v28  ;;  %v768_v63 = vpop.f32.mrb[31].mxu1 }
 0x3f4   :  { %v769_v1 = vadd.f32 %v881_v28, %v768_v63 }
 0x3f5   :  { %v976_v2 = vpack.c.bf16 %v777_v62, %v774_v61 }
 0x3f6   :  { %v971_v3 = vpack.c.bf16 %v769_v1, %v766_v0 }
 0x3f7   :  { %984 = vst [vmem:[#allocation10 + $0x38] sm:$0xff] %v976_v2  }
 0x3f8   :  { %983 = vst [vmem:[#allocation10 + $0x30] sm:$0xff] %v971_v3  }
 0x3f9   :  { %1309 = shalt.err (!%p1306_p8)
}
 0x3fa   :  { %s1310_s14 = scalar_lea.hbm %s1506_s7, 1024 }
 0x3fb   :  { %p1311_p9 = scmp.ne.s32.totalorder %s1506_s7, %s1310_s14  ;;  %p1314_p10 = scmp.lt.u32.totalorder %s1310_s14, %s1506_s7 }
 0x3fd   :  { %p1316_p11 = pnand %p1314_p10, %p1311_p9 }
 0x3ff   :  { %1319 = shalt.err (!%p1316_p11)
}
 0x400   :  { %871 = dma.vmem_to_hbm [thread:$0]  %s866_s8, 1024, %s1506_s7, [#allocation4], %s1329_s11, %s1329_s11, %s1330_s12  }
 0x401   :  { %1326 = dma.done.wait [#allocation4], 1024  }
 0x402   :  { %1327 = vsyncadd [#allocation4], 4294966272 }
 0x403   :  { %875 = vsyncpa [#allocation3], 1 }
 0x404   :  { %876 = vsyncpa [#allocation6], 1 }
 0x405   :  { %877 = vsyncpa [#allocation9], 1 }
 0x406   :  { %878 = vsyncpa [#allocation4], 1 }

</bundles_post_ra>
